<compile_context>
chip_gen: v6e
topology: v6e:2x2x1
jax: 0.10.0
libtpu: 0.0.40
codegen_flags: <defaults>
</compile_context>

<pallas_src>
import functools

import jax
import jax.numpy as jnp
from jax.experimental import pallas as pl
from jax.experimental.pallas import tpu as pltpu


def _gelu_tanh(x):
    # GELU(approximate='tanh'): 0.5*x*(1 + tanh(sqrt(2/pi)*(x + 0.044715*x^3)))
    c = jnp.sqrt(jnp.float32(2.0 / jnp.pi))
    return 0.5 * x * (1.0 + jnp.tanh(c * (x + 0.044715 * x * x * x)))


def mlp_kernel(x_ref, w1_ref, b1_ref, w2_ref, b2_ref, o_ref, acc_ref):
    # x_ref:  (tm, C)        w1_ref: (C, th)     b1_ref: (1, H)  (full, resident)
    # w2_ref: (th, C)        b2_ref: (1, C)      (full, resident)
    # o_ref:  (tm, C)        acc_ref: (tm, C) f32 scratch
    k = pl.program_id(1)
    th = w1_ref.shape[1]

    @pl.when(k == 0)
    def _():
        acc_ref[...] = jnp.zeros_like(acc_ref)

    # c_fc chunk: x @ W1[:, k*th : (k+1)*th] -> (tm, th); f32 accumulation.
    h = jnp.dot(x_ref[...], w1_ref[...], preferred_element_type=jnp.float32)

    # Bias chunk sliced from the resident full b1 (no per-step 1-row DMA).
    start = k * th
    if th % 128 == 0:
        start = pl.multiple_of(start, 128)
    h = h + b1_ref[:, pl.ds(start, th)].astype(jnp.float32)

    # GELU (tanh approximation) in f32.
    h = _gelu_tanh(h)

    # TODO(synk): fc_dropout / proj_dropout are identity in eval mode; a
    # training-mode variant would mask with pltpu.prng_random_bits here.

    # c_proj chunk: accumulate gelu(.) @ W2[k*th:(k+1)*th, :] into (tm, C).
    acc_ref[...] += jnp.dot(h.astype(w2_ref.dtype), w2_ref[...],
                            preferred_element_type=jnp.float32)

    @pl.when(k == pl.num_programs(1) - 1)
    def _():
        y = acc_ref[...] + b2_ref[...].astype(jnp.float32)
        o_ref[...] = y.astype(o_ref.dtype)


def _round_up(a, b):
    return (a + b - 1) // b * b


def _aligned_divisor(h, upper, align):
    # Largest multiple of `align` that divides h and is <= upper; 0 if none.
    t = (min(upper, h) // align) * align
    while t >= align:
        if h % t == 0:
            return t
        t -= align
    return 0


def _tpu_generation():
    """Returns (device_kind_lowercase, physical_vmem_bytes)."""
    kind = ""
    try:
        kind = jax.devices()[0].device_kind.lower()
    except Exception:  # pragma: no cover - defensive
        pass
    vmem = None
    try:
        vmem = int(pltpu.get_tpu_info().vmem_capacity_bytes)
    except Exception:
        pass
    if vmem is None:
        vmem = (64 << 20) if ("v7" in kind or "7x" in kind) else (128 << 20)
    return kind, vmem


def _vmem_bytes(tm, th, C, H, x_isz, w_isz):
    # Conservative estimate of the kernel's VMEM footprint (double-buffered
    # pipelined blocks + scratch + live f32 intermediate h).
    return (2 * tm * C * x_isz        # x tiles
            + 2 * tm * C * x_isz      # out tiles
            + tm * C * 4              # f32 accumulator scratch
            + tm * th * 4             # live f32 intermediate h (headroom)
            + 2 * C * th * w_isz      # W1 blocks
            + 2 * th * C * w_isz      # W2 blocks
            + 2 * H * w_isz           # b1 (full, resident)
            + 2 * C * w_isz)          # b2 (full, resident)


def _plan_tiles(M, C, H, x_isz, w_isz, kind, phys_vmem):
    # Per-generation targets.
    if "v7" in kind or "7x" in kind:
        tm_target, th_align = 512, 256          # ~310 FLOPs/byte roofline
    elif "v6" in kind:
        tm_target, th_align = 1024, 256         # ~714 FLOPs/byte roofline
    elif "v5" in kind:
        tm_target, th_align = 512, 128          # 4x128x128 MXU
    else:
        tm_target, th_align = 512, 256
    budget = phys_vmem - (16 << 20)             # leave compiler headroom

    mp8 = _round_up(max(M, 1), 8)
    tm = min(tm_target, mp8)
    # v7x: make sure the "parallel" row axis has >= 2 tiles so both
    # TensorCores get work.
    if ("v7" in kind or "7x" in kind) and mp8 > 8 and pl.cdiv(mp8, tm) < 2:
        tm = _round_up(pl.cdiv(mp8, 2), 8)

    def fits(tm_, th_):
        return _vmem_bytes(tm_, th_, C, H, x_isz, w_isz) <= budget

    while True:
        # 1) Weight-resident: th = H -> W1/W2 DMA'd from HBM exactly once.
        if fits(tm, H):
            return tm, H
        # 2) Stream hidden dim in MXU-aligned chunks (256 on v6e/v7x).
        for align in (th_align, 128):
            th = _aligned_divisor(H, H, align)
            while th and not fits(tm, th):
                th = _aligned_divisor(H, th - align, align)
            if th:
                return tm, th
        # 3) Shrink the row tile and retry.
        if tm <= 8:
            return tm, H
        tm = max(8, _round_up(tm // 2, 8))


@functools.partial(jax.jit, static_argnames=("matmul_dtype",))
def mlp_pallas(x, w1, b1, w2, b2, *, matmul_dtype=None):
    B, T, C = x.shape
    H = w1.shape[1]  # 4*C
    M = B * T
    x2d = x.reshape(M, C)

    # Optional operand cast for the MXU (recommended for f32 inputs on v7x,
    # which has no native fp32 MXU). Accumulation / epilogue stay f32.
    if matmul_dtype is not None:
        x2d = x2d.astype(matmul_dtype)
        w1 = w1.astype(matmul_dtype)
        w2 = w2.astype(matmul_dtype)

    kind, phys_vmem = _tpu_generation()
    x_isz = jnp.dtype(x2d.dtype).itemsize
    w_isz = jnp.dtype(w1.dtype).itemsize

    tm_eff, th_eff = _plan_tiles(M, C, H, x_isz, w_isz, kind, phys_vmem)
    grid_m = pl.cdiv(M, tm_eff)          # ragged last tile handled by masking,
    grid_k = H // th_eff                 # no jnp.pad HBM copy of activations.
    weights_resident = (th_eff == H)

    vmem_needed = _vmem_bytes(tm_eff, th_eff, C, H, x_isz, w_isz)
    vmem_cap = phys_vmem - (8 << 20)     # never request >= physical VMEM
    vmem_limit = int(min(max(vmem_needed * 5 // 4 + (4 << 20), 32 << 20),
                         vmem_cap))

    # Advisory cost: weights are re-read once per row tile unless resident.
    weight_reads = 1 if weights_resident else grid_m
    cost = pl.CostEstimate(
        flops=int(4 * M * C * H),                 # two matmuls: 2*M*C*H each
        transcendentals=int(M * H),               # tanh in GELU
        bytes_accessed=int(2 * M * C * x_isz      # x in + out
                           + weight_reads * (C * H + H * C) * w_isz
                           + (H + C) * w_isz),
    )

    out2d = pl.pallas_call(
        mlp_kernel,
        out_shape=jax.ShapeDtypeStruct((M, C), x.dtype),
        grid_spec=pltpu.PrefetchScalarGridSpec(
            num_scalar_prefetch=0,
            grid=(grid_m, grid_k),
            in_specs=[
                pl.BlockSpec((tm_eff, C), lambda i, k: (i, 0)),    # x tile
                pl.BlockSpec((C, th_eff), lambda i, k: (0, k)),    # W1 chunk
                pl.BlockSpec((1, H), lambda i, k: (0, 0)),         # b1 (full)
                pl.BlockSpec((th_eff, C), lambda i, k: (k, 0)),    # W2 chunk
                pl.BlockSpec((1, C), lambda i, k: (0, 0)),         # b2 (full)
            ],
            out_specs=pl.BlockSpec((tm_eff, C), lambda i, k: (i, 0)),
            scratch_shapes=[pltpu.VMEM((tm_eff, C), jnp.float32)],
        ),
        compiler_params=pltpu.CompilerParams(
            dimension_semantics=("parallel", "arbitrary"),
            vmem_limit_bytes=vmem_limit,
        ),
        cost_estimate=cost,
    )(x2d, w1, b1, w2, b2)

    return out2d.reshape(B, T, C)


def init_params(key, n_embd, dtype=jnp.float32):
    # Matches nn.Linear default init: U(-1/sqrt(fan_in), 1/sqrt(fan_in)).
    h = 4 * n_embd
    k1, k2, k3, k4 = jax.random.split(key, 4)
    bound_fc = 1.0 / jnp.sqrt(n_embd)
    bound_pr = 1.0 / jnp.sqrt(h)
    w1 = jax.random.uniform(k1, (n_embd, h), jnp.float32, -bound_fc, bound_fc)
    b1 = jax.random.uniform(k2, (1, h), jnp.float32, -bound_fc, bound_fc)
    w2 = jax.random.uniform(k3, (h, n_embd), jnp.float32, -bound_pr, bound_pr)
    b2 = jax.random.uniform(k4, (1, n_embd), jnp.float32, -bound_pr, bound_pr)
    return (w1.astype(dtype), b1.astype(dtype),
            w2.astype(dtype), b2.astype(dtype))


def mlp_reference(x, w1, b1, w2, b2):
    x = x.astype(jnp.float32)
    h = x @ w1.astype(jnp.float32) + b1.astype(jnp.float32)
    h = _gelu_tanh(h)
    return h @ w2.astype(jnp.float32) + b2.astype(jnp.float32)


if __name__ == "__main__":
    key = jax.random.PRNGKey(0)
    kx, kp = jax.random.split(key)

    B, T, n_embd = 2, 8, 32
    x = jax.random.normal(kx, (B, T, n_embd), jnp.float32)
    w1, b1, w2, b2 = init_params(kp, n_embd)
    ref = mlp_reference(x, w1, b1, w2, b2)

    # f32 path (operands stay f32; f32 accumulation). Tolerance slightly
    # relaxed vs 1e-5 to accommodate multi-pass bf16 fp32 emulation on v7x.
    out = jax.block_until_ready(mlp_pallas(x, w1, b1, w2, b2))
    assert out.shape == (B, T, n_embd)
    assert jnp.allclose(out, ref, atol=1e-4, rtol=1e-4)

    # bf16 path (bf16 MXU operands, f32 accumulation/GELU).
    xb = x.astype(jnp.bfloat16)
    w1b, b1b, w2b, b2b = (a.astype(jnp.bfloat16) for a in (w1, b1, w2, b2))
    out_bf16 = jax.block_until_ready(mlp_pallas(xb, w1b, b1b, w2b, b2b))
    assert out_bf16.shape == (B, T, n_embd)
    assert jnp.allclose(out_bf16.astype(jnp.float32), ref, atol=5e-2, rtol=5e-2)

    # f32 inputs with bf16 MXU operands (the fast path recommended on v7x).
    out_cast = jax.block_until_ready(
        mlp_pallas(x, w1, b1, w2, b2, matmul_dtype=jnp.bfloat16))
    assert out_cast.shape == (B, T, n_embd)
    assert jnp.allclose(out_cast, ref, atol=5e-2, rtol=5e-2)

    print("KERNEL_OK")
</pallas_src>

<mosaic_0001>
module attributes {stable_mosaic.version = 11 : i64} {
  func.func @mlp_kernel(%arg0: i32, %arg1: i32, %arg2: memref<16x32xf32, #tpu.memory_space<vmem>>, %arg3: memref<32x128xf32, #tpu.memory_space<vmem>>, %arg4: memref<1x128xf32, #tpu.memory_space<vmem>>, %arg5: memref<128x32xf32, #tpu.memory_space<vmem>>, %arg6: memref<1x32xf32, #tpu.memory_space<vmem>>, %arg7: memref<16x32xf32, #tpu.memory_space<vmem>>, %arg8: memref<16x32xf32, #tpu.memory_space<vmem>>) attributes {dimension_semantics = [#tpu.dimension_semantics<parallel>, #tpu.dimension_semantics<arbitrary>], iteration_bounds = array<i64: 1, 1>, scalar_prefetch = 0 : i64, scratch_operands = 1 : i64, tpu.core_type = #tpu.core_type<tc>, window_params = [{transform_indices = @transform_0, window_bounds = array<i64: 16, 32>}, {transform_indices = @transform_1, window_bounds = array<i64: 32, 128>}, {pipeline_mode = #tpu.pipeline_mode<synchronous>, transform_indices = @transform_2, window_bounds = array<i64: 1, 128>}, {transform_indices = @transform_3, window_bounds = array<i64: 128, 32>}, {pipeline_mode = #tpu.pipeline_mode<synchronous>, transform_indices = @transform_4, window_bounds = array<i64: 1, 32>}, {transform_indices = @transform_5, window_bounds = array<i64: 16, 32>}]} {
    %c0_i32 = arith.constant 0 : i32
    %0 = arith.cmpi eq, %arg1, %c0_i32 : i32
    %1 = arith.extui %0 : i1 to i32
    %c0_i32_0 = arith.constant 0 : i32
    %2 = arith.cmpi ne, %1, %c0_i32_0 : i32
    scf.if %2 {
      %cst_18 = arith.constant 0.000000e+00 : f32
      %34 = vector.broadcast %cst_18 : f32 to vector<16x32xf32>
      %c0_19 = arith.constant 0 : index
      %c0_20 = arith.constant 0 : index
      %35 = vector.load %arg8[%c0_19, %c0_20] : memref<16x32xf32, #tpu.memory_space<vmem>>, vector<16x32xf32>
      tpu.vector_store %arg8[%c0_19, %c0_20], %34 {strides = array<i32>} : memref<16x32xf32, #tpu.memory_space<vmem>>, vector<16x32xf32>,
    } else {
    }
    %c0 = arith.constant 0 : index
    %c0_1 = arith.constant 0 : index
    %3 = vector.load %arg2[%c0, %c0_1] : memref<16x32xf32, #tpu.memory_space<vmem>>, vector<16x32xf32>
    %c0_2 = arith.constant 0 : index
    %c0_3 = arith.constant 0 : index
    %4 = vector.load %arg3[%c0_2, %c0_3] : memref<32x128xf32, #tpu.memory_space<vmem>>, vector<32x128xf32>
    %cst = arith.constant dense<0.000000e+00> : vector<16x128xf32>
    %5 = tpu.matmul %3, %4, %cst {dimension_numbers = #tpu.dot_dimension_numbers<[1], [0], [0], [1], [0, 0, 1, 1], [], []>} : vector<16x32xf32>, vector<32x128xf32>, vector<16x128xf32> -> vector<16x128xf32>
    %c128_i32 = arith.constant 128 : i32
    %6 = arith.muli %arg1, %c128_i32 : i32
    %7 = tpu.assume_multiple %6, 128 : i32
    %c0_4 = arith.constant 0 : index
    %8 = arith.index_cast %7 : i32 to index
    %9 = vector.load %arg4[%c0_4, %8] : memref<1x128xf32, #tpu.memory_space<vmem>>, vector<1x128xf32>
    %10 = vector.broadcast %9 : vector<1x128xf32> to vector<16x128xf32>
    %11 = arith.addf %5, %10 : vector<16x128xf32>
    %cst_5 = arith.constant 0.636619746 : f32
    %12 = math.sqrt %cst_5 : f32
    %cst_6 = arith.constant 5.000000e-01 : f32
    %13 = vector.broadcast %cst_6 : f32 to vector<16x128xf32>
    %14 = arith.mulf %13, %11 : vector<16x128xf32>
    %cst_7 = arith.constant 4.471500e-02 : f32
    %15 = vector.broadcast %cst_7 : f32 to vector<16x128xf32>
    %16 = arith.mulf %15, %11 : vector<16x128xf32>
    %17 = arith.mulf %16, %11 : vector<16x128xf32>
    %18 = arith.mulf %17, %11 : vector<16x128xf32>
    %19 = arith.addf %11, %18 : vector<16x128xf32>
    %20 = vector.broadcast %12 : f32 to vector<16x128xf32>
    %21 = arith.mulf %20, %19 : vector<16x128xf32>
    %22 = math.tanh %21 : vector<16x128xf32>
    %cst_8 = arith.constant 1.000000e+00 : f32
    %23 = vector.broadcast %cst_8 : f32 to vector<16x128xf32>
    %24 = arith.addf %23, %22 : vector<16x128xf32>
    %25 = arith.mulf %14, %24 : vector<16x128xf32>
    %c0_9 = arith.constant 0 : index
    %c0_10 = arith.constant 0 : index
    %26 = vector.load %arg8[%c0_9, %c0_10] : memref<16x32xf32, #tpu.memory_space<vmem>>, vector<16x32xf32>
    %c0_11 = arith.constant 0 : index
    %c0_12 = arith.constant 0 : index
    %27 = vector.load %arg5[%c0_11, %c0_12] : memref<128x32xf32, #tpu.memory_space<vmem>>, vector<128x32xf32>
    %cst_13 = arith.constant dense<0.000000e+00> : vector<16x32xf32>
    %28 = tpu.matmul %25, %27, %cst_13 {dimension_numbers = #tpu.dot_dimension_numbers<[1], [0], [0], [1], [0, 0, 1, 1], [], []>} : vector<16x128xf32>, vector<128x32xf32>, vector<16x32xf32> -> vector<16x32xf32>
    %29 = arith.addf %26, %28 : vector<16x32xf32>
    %c0_14 = arith.constant 0 : index
    %c0_15 = arith.constant 0 : index
    %30 = vector.load %arg8[%c0_14, %c0_15] : memref<16x32xf32, #tpu.memory_space<vmem>>, vector<16x32xf32>
    tpu.vector_store %arg8[%c0_14, %c0_15], %29 {strides = array<i32>} : memref<16x32xf32, #tpu.memory_space<vmem>>, vector<16x32xf32>,
    %c0_i32_16 = arith.constant 0 : i32
    %31 = arith.cmpi eq, %arg1, %c0_i32_16 : i32
    %32 = arith.extui %31 : i1 to i32
    %c0_i32_17 = arith.constant 0 : i32
    %33 = arith.cmpi ne, %32, %c0_i32_17 : i32
    scf.if %33 {
      %c0_18 = arith.constant 0 : index
      %c0_19 = arith.constant 0 : index
      %34 = vector.load %arg8[%c0_18, %c0_19] : memref<16x32xf32, #tpu.memory_space<vmem>>, vector<16x32xf32>
      %c0_20 = arith.constant 0 : index
      %c0_21 = arith.constant 0 : index
      %35 = vector.load %arg6[%c0_20, %c0_21] : memref<1x32xf32, #tpu.memory_space<vmem>>, vector<1x32xf32>
      %36 = vector.broadcast %35 : vector<1x32xf32> to vector<16x32xf32>
      %37 = arith.addf %34, %36 : vector<16x32xf32>
      %c0_22 = arith.constant 0 : index
      %c0_23 = arith.constant 0 : index
      %38 = vector.load %arg7[%c0_22, %c0_23] : memref<16x32xf32, #tpu.memory_space<vmem>>, vector<16x32xf32>
      tpu.vector_store %arg7[%c0_22, %c0_23], %37 {strides = array<i32>} : memref<16x32xf32, #tpu.memory_space<vmem>>, vector<16x32xf32>,
    } else {
    }
    return
  }
  func.func @transform_0(%arg0: i32, %arg1: i32) -> (i32, i32) {
    %c0_i32 = arith.constant 0 : i32
    %c0_i32_0 = arith.constant 0 : i32
    return %arg0, %c0_i32 : i32, i32
  }
  func.func @transform_1(%arg0: i32, %arg1: i32) -> (i32, i32) {
    %c0_i32 = arith.constant 0 : i32
    %c0_i32_0 = arith.constant 0 : i32
    return %c0_i32, %arg1 : i32, i32
  }
  func.func @transform_2(%arg0: i32, %arg1: i32) -> (i32, i32) {
    %c0_i32 = arith.constant 0 : i32
    %c0_i32_0 = arith.constant 0 : i32
    %c0_i32_1 = arith.constant 0 : i32
    return %c0_i32, %c0_i32_0 : i32, i32
  }
  func.func @transform_3(%arg0: i32, %arg1: i32) -> (i32, i32) {
    %c0_i32 = arith.constant 0 : i32
    %c0_i32_0 = arith.constant 0 : i32
    return %arg1, %c0_i32 : i32, i32
  }
  func.func @transform_4(%arg0: i32, %arg1: i32) -> (i32, i32) {
    %c0_i32 = arith.constant 0 : i32
    %c0_i32_0 = arith.constant 0 : i32
    %c0_i32_1 = arith.constant 0 : i32
    return %c0_i32, %c0_i32_0 : i32, i32
  }
  func.func @transform_5(%arg0: i32, %arg1: i32) -> (i32, i32) {
    %c0_i32 = arith.constant 0 : i32
    %c0_i32_0 = arith.constant 0 : i32
    return %arg0, %c0_i32 : i32, i32
  }
}

</mosaic_0001>

<bundles_post_ra>
// kernel: mlp_pallas.1
= control target key start
LH: loop header
LB: loop body
LE: loop exit
PB: predicated region body
PF: predicated region fallthrough
CT: control target
= control target key end

     0   :  { %vm25_vm0 = vcmask 261120   ;;  %s496_s0 = inlined_call_operand.vmem [shape: f32[16,32], index: 0, kind: input, shape index: {}]   ;;  %s497_s1 = inlined_call_operand.vmem [shape: f32[32,128], index: 1, kind: input, shape index: {}]   ;;  %s498_s2 = inlined_call_operand.vmem [shape: f32[1,128], index: 2, kind: input, shape index: {}]   ;;  %s499_s3 = inlined_call_operand.vmem [shape: f32[128,32], index: 3, kind: input, shape index: {}]   ;;  %s500_s4 = inlined_call_operand.vmem [shape: f32[1,32], index: 4, kind: input, shape index: {}]   ;;  %s501_s5 = inlined_call_operand.hbm [shape: f32[16,32], index: 5, kind: output, shape index: {}]  }
   0x1   :  { %v33_v0 = vld [vmem:[%s497_s1 + $0x18] sm:$0xff]  ;;  %v32_v1 = vld [vmem:[%s497_s1 + $0x10] sm:$0xff]  ;;  %v28_v2 = vld [vmem:[%s496_s0] sm:$0xff] }
   0x2   :  { %303 = vmatprep.subr.mxu0 %v33_v0  ;;  %v31_v3 = vld [vmem:[%s497_s1 + $0x8] sm:$0xff]  ;;  %311 = vmatprep.mubr.msk.f32.mxu0 %vm25_vm0, %v28_v2 }
   0x3   :  { %304 = vmatpush3.msra.mxu0 %v33_v0 }
   0x4   :  { %10 = vsyncpa [#allocation4], 0  ;;  %305 = vmatprep.subr.mxu0 %v32_v1  ;;  %v30_v4 = vld [vmem:[%s497_s1] sm:$0xff]  ;;  %v29_v5 = vld [vmem:[%s496_s0 + $0x8] sm:$0xff]  ;;  %v379_v22 = vmov 0.0   ;;  %s380_s10 = smov [#allocation3]  }
   0x5   :  { %306 = vmatpush3.msra.mxu0 %v32_v1  ;;  %v162_v6 = vld [vmem:[%s499_s3 + $0x78] sm:$0xff]  ;;  %v161_v7 = vld [vmem:[%s499_s3 + $0x70] sm:$0xff]  ;;  %v160_v8 = vld [vmem:[%s499_s3 + $0x68] sm:$0xff]  ;;  %27 = vst.msk [vmem:[#allocation2 + $0x8] sm:$0xff] %vm25_vm0, %v379_v22  ;;  %s263_s11 = sshll.u32 %s380_s10, 4  ;;  %s264_s11 = int_to_ptr.vmem [resolvable:$true] %s263_s11 }
   0x6   :  { %307 = vmatprep.subr.mxu0 %v31_v3  ;;  %314 = vmatprep.subr.mxu1 %v162_v6  ;;  %v159_v9 = vld [vmem:[%s499_s3 + $0x60] sm:$0xff]  ;;  %v158_v10 = vld [vmem:[%s499_s3 + $0x58] sm:$0xff]  ;;  %v157_v11 = vld [vmem:[%s499_s3 + $0x50] sm:$0xff]  ;;  %26 = vst.msk [vmem:[#allocation2] sm:$0xff] %vm25_vm0, %v379_v22  ;;  %s357_s12 = scalar_lea.vmem %s264_s11, 256  ;;  %p362_p1 = scmp.lt.s32.totalorder %s264_s11, %s264_s11 }
   0x7   :  { %308 = vmatpush3.msra.mxu0 %v31_v3  ;;  %315 = vmatpush3.msra.mxu1 %v162_v6  ;;  %v156_v12 = vld [vmem:[%s499_s3 + $0x48] sm:$0xff]  ;;  %v155_v13 = vld [vmem:[%s499_s3 + $0x40] sm:$0xff]  ;;  %v154_v14 = vld [vmem:[%s499_s3 + $0x38] sm:$0xff]  ;;  %p358_p0 = scmp.ne.s32.totalorder %s264_s11, %s357_s12  ;;  %p363_p2 = scmp.lt.s32.totalorder %s357_s12, %s357_s12 }
   0x8   :  { %309 = vmatprep.subr.mxu0 %v30_v4  ;;  %316 = vmatprep.subr.mxu1 %v161_v7  ;;  %v153_v15 = vld [vmem:[%s499_s3 + $0x30] sm:$0xff]  ;;  %v152_v16 = vld [vmem:[%s499_s3 + $0x28] sm:$0xff]  ;;  %v151_v17 = vld [vmem:[%s499_s3 + $0x20] sm:$0xff] }
   0x9   :  { %310 = vmatpush3.msra.mxu0 %v30_v4  ;;  %317 = vmatpush3.msra.mxu1 %v161_v7  ;;  %v150_v18 = vld [vmem:[%s499_s3 + $0x18] sm:$0xff]  ;;  %v149_v19 = vld [vmem:[%s499_s3 + $0x10] sm:$0xff]  ;;  %v148_v20 = vld [vmem:[%s499_s3 + $0x8] sm:$0xff]  ;;  %p364_p3 = por %p363_p2, %p362_p1 }
   0xa   :  { %312 = vmatmul.mubr.msk.f32.vlgmr.msra.gmra.mxu0 %vm25_vm0, %v29_v5  ;;  %318 = vmatprep.subr.mxu1 %v160_v8  ;;  %v147_v21 = vld [vmem:[%s499_s3] sm:$0xff] }
   0xb   :  { %319 = vmatpush3.msra.mxu1 %v160_v8  ;;  %v275_v23 = vld [vmem:[%s498_s2] ss:$0 sm:$0xff]  ;;  %p365_p4 = pnand %p364_p3, %p358_p0 }
   0xc   :  { %320 = vmatprep.subr.mxu1 %v159_v9  ;;  %v146_v46 = vld [vmem:[#allocation2 + $0x8] sm:$0xff]  ;;  %v278_v52 = vld [vmem:[%s500_s4] ss:$0 sm:$0xff] }
   0xd   :  { %321 = vmatpush3.msra.mxu1 %v159_v9  ;;  %v145_v48 = vld [vmem:[#allocation2] sm:$0xff] }
   0xe   :  { %322 = vmatprep.subr.mxu1 %v158_v10 }
   0xf   :  { %323 = vmatpush3.msra.mxu1 %v158_v10 }
  0x10   :  { %324 = vmatprep.subr.mxu1 %v157_v11 }
  0x11   :  { %325 = vmatpush3.msra.mxu1 %v157_v11 }
  0x12   :  { %326 = vmatprep.subr.mxu1 %v156_v12 }
  0x13   :  { %327 = vmatpush3.msra.mxu1 %v156_v12 }
  0x14   :  { %328 = vmatprep.subr.mxu1 %v155_v13 }
  0x15   :  { %329 = vmatpush3.msra.mxu1 %v155_v13 }
  0x16   :  { %330 = vmatprep.subr.mxu1 %v154_v14 }
  0x17   :  { %331 = vmatpush3.msra.mxu1 %v154_v14 }
  0x18   :  { %332 = vmatprep.subr.mxu1 %v153_v15 }
  0x19   :  { %333 = vmatpush3.msra.mxu1 %v153_v15 }
  0x1a   :  { %334 = vmatprep.subr.mxu1 %v152_v16 }
  0x1b   :  { %335 = vmatpush3.msra.mxu1 %v152_v16 }
  0x1c   :  { %336 = vmatprep.subr.mxu1 %v151_v17 }
  0x1d   :  { %337 = vmatpush3.msra.mxu1 %v151_v17 }
  0x1e   :  { %338 = vmatprep.subr.mxu1 %v150_v18 }
  0x1f   :  { %339 = vmatpush3.msra.mxu1 %v150_v18 }
  0x20   :  { %340 = vmatprep.subr.mxu1 %v149_v19 }
  0x21   :  { %341 = vmatpush3.msra.mxu1 %v149_v19 }
  0x22   :  { %342 = vmatprep.subr.mxu1 %v148_v20 }
  0x23   :  { %343 = vmatpush3.msra.mxu1 %v148_v20 }
  0x24   :  { %344 = vmatprep.subr.mxu1 %v147_v21 }
  0x25   :  { %345 = vmatpush3.msra.mxu1 %v147_v21 }
  0xca   :  { %v313_v24 = vpop.f32.mrf.mxu0 }
  0xcb   :  { %v124_v25 = vadd.f32 %v313_v24, %v275_v23 }
  0xcc   :  { %v118_v26 = vpop.f32.mrf.mxu0 }
  0xcd   :  { %v130_v27 = vmul.f32 0.044715, %v124_v25  ;;  %v119_v28 = vadd.f32 %v275_v23, %v118_v26  ;;  %v128_v43 = vmul.f32 0.5, %v124_v25 }
  0xcf   :  { %v132_v29 = vmul.f32 %v130_v27, %v124_v25  ;;  %v129_v30 = vmul.f32 0.044715, %v119_v28  ;;  %v127_v41 = vmul.f32 0.5, %v119_v28 }
  0xd1   :  { %v131_v31 = vmul.f32 %v129_v30, %v119_v28  ;;  %v134_v32 = vmul.f32 %v132_v29, %v124_v25 }
  0xd3   :  { %v133_v33 = vmul.f32 %v131_v31, %v119_v28  ;;  %v136_v34 = vadd.f32 %v134_v32, %v124_v25 }
  0xd5   :  { %v135_v35 = vadd.f32 %v133_v33, %v119_v28  ;;  %v138_v36 = vmul.f32 0.7978845, %v136_v34 }
  0xd7   :  { %v137_v37 = vmul.f32 0.7978845, %v135_v35  ;;  %353 = vtanh.f32 %v138_v36 }
  0xd9   :  { %355 = vtanh.f32 %v137_v37 }
  0xe4   :  { %v354_v38 = vpop.eup %353 }
  0xe5   :  { %v142_v40 = vadd.f32 1.0, %v354_v38 }
  0xe6   :  { %v356_v39 = vpop.eup %355 }
  0xe7   :  { %v141_v42 = vadd.f32 1.0, %v356_v39  ;;  %v144_v45 = vmul.f32 %v142_v40, %v128_v43 }
  0xe9   :  { %v143_v44 = vmul.f32 %v141_v42, %v127_v41 }
  0xeb   :  { %346 = vmatprep.mubr.f32.mxu1 %v143_v44 }
  0xec   :  { %347 = vmatmul.mubr.f32.vlgmr.msra.gmra.mxu1 %v144_v45 }
 0x1ac   :  { %v348_v47 = vpop.f32.mrf.mxu1 }
 0x1ad   :  { %v239_v49 = vadd.f32 %v348_v47, %v146_v46 }
 0x1ae   :  { %v229_v50 = vpop.f32.mrf.mxu1 }
 0x1af   :  { %241 = vst.msk [vmem:[#allocation2 + $0x8] sm:$0xff] %vm25_vm0, %v239_v49  ;;  %v238_v51 = vadd.f32 %v229_v50, %v145_v48 }
 0x1b1   :  { %240 = vst.msk [vmem:[#allocation2] sm:$0xff] %vm25_vm0, %v238_v51 }
 0x1b6   :  { %v246_v53 = vld [vmem:[#allocation2 + $0x8] sm:$0xff] }
 0x1b7   :  { %v255_v54 = vadd.f32 %v278_v52, %v246_v53 }
 0x1b8   :  { %v245_v55 = vld [vmem:[#allocation2] sm:$0xff] }
 0x1b9   :  { %v254_v56 = vadd.f32 %v278_v52, %v245_v55  ;;  %257 = vst.msk [vmem:[#allocation3 + $0x8] sm:$0xff] %vm25_vm0, %v255_v54 }
 0x1bb   :  { %256 = vst.msk [vmem:[#allocation3] sm:$0xff] %vm25_vm0, %v254_v56 }
 0x1bc   :  { %368 = shalt.err (!%p365_p4)
}
 0x1bd   :  { %s381_s13 = smov 128   ;;  %s382_s4 = smov 8  }
 0x1be   :  { %269 = dma.vmem_to_hbm [thread:$0]  %s264_s11, 256, %s501_s5, [#allocation4], %s381_s13, %s381_s13, %s382_s4  }
 0x1bf   :  { %377 = dma.done.wait [#allocation4], 256  }
 0x1c0   :  { %378 = vsyncadd [#allocation4], 4294967040 }
 0x1c1   :  { %273 = vsyncpa [#allocation4], 1 }

</bundles_post_ra>
